<compile_context>
chip_gen: v5e
topology: v5e:2x2
jax: 0.10.0
libtpu: 0.0.40
codegen_flags: <defaults>
</compile_context>

<pallas_src>
import math
from functools import partial

import jax
import jax.numpy as jnp
from jax import lax
from jax.experimental import pallas as pl
from jax.experimental.pallas import tpu as pltpu

_INV_SQRT2 = 1.0 / math.sqrt(2.0)


# ----------------------------------------------------------------------------- helpers
def _round_up(x, m):
    return (x + m - 1) // m * m


def _bytes(shape, dtype):
    n = 1
    for d in shape:
        n *= int(d)
    return n * jnp.dtype(dtype).itemsize


def _tpu_vmem_capacity():
    """Physical per-core VMEM in bytes (128 MiB on v5e/v6e, 64 MiB on v7x)."""
    try:
        return int(pltpu.get_tpu_info().vmem_capacity_bytes)
    except Exception:
        try:
            kind = jax.devices()[0].device_kind.lower()
            if "v7" in kind or "7x" in kind:
                return 64 << 20
        except Exception:
            pass
        return 128 << 20


def _is_multi_tensorcore(vmem_capacity):
    """Only v7x has two TensorCores per chip (and 64 MiB VMEM per core)."""
    try:
        kind = jax.devices()[0].device_kind.lower()
        if "v7" in kind or "7x" in kind:
            return True
    except Exception:
        pass
    return vmem_capacity <= (64 << 20)


def _vmem_limit(block_bytes_estimate, vmem_capacity):
    """Generation-aware scoped VMEM limit: up to ~85% of physical capacity so Mosaic
    internal scratch / output double-buffers keep headroom (v7x ~54 MiB, v5e/v6e ~108 MiB)."""
    cap = int(vmem_capacity * 0.85)
    want = int(block_bytes_estimate) + (8 << 20)
    return int(min(cap, max(32 << 20, want)))


def _pick_row_tile(m_rows, multi_tc, target=512):
    """Token-row tile: multiple of 16, <= target, preferring exact divisors of m_rows
    (no padding and no un-pad copy). The '>= 2 grid steps' shrink only applies on
    multi-TensorCore chips (v7x) -- on single-TC v5e/v6e it just hurts DMA efficiency."""
    t = min(target, _round_up(m_rows, 16))
    tile = t
    for cand in range(t, 15, -16):
        if m_rows % cand == 0:
            tile = cand
            break
    if multi_tc:
        while tile > 16 and pl.cdiv(m_rows, tile) < 2:
            tile = _round_up(tile // 2, 16)
    return tile


def _const_spec(block_shape):
    """BlockSpec for a grid-invariant (resident) operand: single VMEM buffer.
    Constant index_map blocks are never re-DMA'd, so the second buffer is waste."""
    ndim = len(block_shape)
    idx = lambda *_args: (0,) * ndim
    try:
        return pl.BlockSpec(block_shape, idx, pipeline_mode=pl.Buffered(1))
    except TypeError:  # older jax without pipeline_mode on BlockSpec
        return pl.BlockSpec(block_shape, idx)


# ----------------------------------------------------------------------------- kernels
def _qkv_kernel(x_ref, w_ref, b_ref, q_ref, k_ref, v_ref, *, scale, compute_dtype):
    # x: [TM, H]   w: [H, 3H]   b: [1, 3H]   q/k/v: [TM, H]
    x = x_ref[...].astype(compute_dtype)
    qkv = jnp.dot(x, w_ref[...], preferred_element_type=jnp.float32) + b_ref[...]
    h = q_ref.shape[-1]
    q_ref[...] = (qkv[:, :h] * scale).astype(q_ref.dtype)        # q_proj(x) * head_dim**-0.5
    k_ref[...] = qkv[:, h:2 * h].astype(k_ref.dtype)
    v_ref[...] = qkv[:, 2 * h:].astype(v_ref.dtype)


def _make_attn_kernel(*, num_heads, mask_mode, compute_dtype, approx_recip):
    """One batch per grid step, all heads processed inside the kernel on a lane-dense
    [S, H] slab (heads sliced as static column windows).  Softmax is normalised after
    PV with pl.reciprocal (exact in the f32 path, approx EUP reciprocal in bf16)."""

    def _attend(q_ref, k_ref, v_ref, o_ref, mask):
        H = q_ref.shape[-1]
        Dh = H // num_heads
        outs = []
        for h in range(num_heads):                       # static unroll over heads
            sl = slice(h * Dh, (h + 1) * Dh)
            q = q_ref[0, :, sl].astype(compute_dtype)    # [S, Dh]
            k = k_ref[0, :, sl].astype(compute_dtype)
            v = v_ref[0, :, sl].astype(compute_dtype)
            s = lax.dot_general(q, k, (((1,), (1,)), ((), ())),
                                preferred_element_type=jnp.float32)   # [S, S]
            if mask is not None:
                s = s + mask
            s = s - jnp.max(s, axis=-1, keepdims=True)
            p = jnp.exp(s)
            denom = jnp.sum(p, axis=-1, keepdims=True)
            # attention dropout: identity in eval mode.
            o = jnp.dot(p.astype(compute_dtype), v, preferred_element_type=jnp.float32)
            outs.append(o * pl.reciprocal(denom, approx=approx_recip))
        # single lane-dense [S, H] write (no per-head 64-lane masked stores).
        o_ref[0] = jnp.concatenate(outs, axis=-1).astype(o_ref.dtype)

    if mask_mode == "none":
        def kernel(q_ref, k_ref, v_ref, o_ref):
            _attend(q_ref, k_ref, v_ref, o_ref, None)
    else:
        def kernel(q_ref, k_ref, v_ref, mask_ref, o_ref):
            # "key" mode: mask_ref[0] is [1, S] and broadcasts over query rows.
            # "full" mode: mask_ref[0] is [S, S].
            _attend(q_ref, k_ref, v_ref, o_ref, mask_ref[0])
    return kernel


def _attn_out_ffn_kernel(ctx_ref, res_ref, wo_ref, bo_ref, g1_ref, bln1_ref,
                         w1_ref, b1_ref, w2_ref, b2_ref, g2_ref, bln2_ref, o_ref,
                         *, eps, compute_dtype):
    # ctx/res: [TM, H]  wo: [H, H]  w1: [H, I]  w2: [I, H]  vectors: [1, *]
    ctx = ctx_ref[...].astype(compute_dtype)
    y = jnp.dot(ctx, wo_ref[...], preferred_element_type=jnp.float32) + bo_ref[...]
    # hidden dropout: identity in eval mode; residual add then LayerNorm (f32 math).
    y = y + res_ref[...].astype(jnp.float32)
    mu = jnp.mean(y, axis=-1, keepdims=True)
    d = y - mu
    var = jnp.mean(d * d, axis=-1, keepdims=True)
    h1 = d * lax.rsqrt(var + eps) * g1_ref[...] + bln1_ref[...]          # LN1 output (f32)
    # FFN intermediate dense + exact (erf) GELU (HF default "gelu").
    t = jnp.dot(h1.astype(compute_dtype), w1_ref[...],
                preferred_element_type=jnp.float32) + b1_ref[...]
    t = 0.5 * t * (1.0 + lax.erf(t * _INV_SQRT2))
    # activation dropout: identity in eval mode.  Output dense (f32 accumulation).
    y2 = jnp.dot(t.astype(compute_dtype), w2_ref[...],
                 preferred_element_type=jnp.float32) + b2_ref[...]
    # output dropout: identity in eval mode; residual add then final LayerNorm.
    y2 = y2 + h1
    mu2 = jnp.mean(y2, axis=-1, keepdims=True)
    d2 = y2 - mu2
    var2 = jnp.mean(d2 * d2, axis=-1, keepdims=True)
    o_ref[...] = (d2 * lax.rsqrt(var2 + eps) * g2_ref[...] + bln2_ref[...]).astype(o_ref.dtype)


# ----------------------------------------------------------------------------- wrapper
def wav2vec2_encoder_layer(hidden_states, params, attention_mask=None, *,
                           num_heads, layer_norm_eps=1e-5,
                           compute_dtype=jnp.bfloat16, row_tile=None):
    """Eval-mode forward of Wav2Vec2EncoderLayer.

    hidden_states: [B, S, H]
    attention_mask: None, additive key mask [B, 1, 1, S], or additive full mask [B, 1, S, S]
    params (pre-transposed [in, out] linear weights == PyTorch weight.T):
        q_w, k_w, v_w, o_w: [H, H]   q_b, k_b, v_b, o_b: [H]
        ln1_g, ln1_b, ln2_g, ln2_b: [H]
        w1: [H, I]  b1: [I]  w2: [I, H]  b2: [H]
    compute_dtype: MXU operand dtype (bf16 default, f32 accumulation everywhere).
    Note: fully masked query rows return the uniform-softmax mean of V (same as PyTorch).
    """
    B, S, H = hidden_states.shape
    assert H % num_heads == 0
    Dh = H // num_heads
    scale = float(Dh) ** -0.5
    I = params["w1"].shape[1]
    in_dtype = hidden_states.dtype
    cd = jnp.dtype(compute_dtype)
    cb = cd.itemsize

    vmem_cap = _tpu_vmem_capacity()
    multi_tc = _is_multi_tensorcore(vmem_cap)

    M = B * S
    if row_tile is None:
        row_tile = _pick_row_tile(M, multi_tc)
    Mp = _round_up(M, row_tile)
    n_row = Mp // row_tile

    x2d = hidden_states.reshape(M, H)
    x2d_p = jnp.pad(x2d, ((0, Mp - M), (0, 0))) if Mp != M else x2d

    # ---- parameter staging: MXU operands cast to compute_dtype once (halves HBM traffic)
    w_qkv = jnp.concatenate(
        [params["q_w"], params["k_w"], params["v_w"]], axis=1).astype(cd)            # [H, 3H]
    b_qkv = jnp.concatenate(
        [params["q_b"], params["k_b"], params["v_b"]]).reshape(1, 3 * H).astype(jnp.float32)
    w_o = params["o_w"].astype(cd)
    b_o = params["o_b"].reshape(1, H).astype(jnp.float32)
    g1 = params["ln1_g"].reshape(1, H).astype(jnp.float32)
    bln1 = params["ln1_b"].reshape(1, H).astype(jnp.float32)
    w1 = params["w1"].astype(cd)
    b1 = params["b1"].reshape(1, I).astype(jnp.float32)
    w2 = params["w2"].astype(cd)
    b2 = params["b2"].reshape(1, H).astype(jnp.float32)
    g2 = params["ln2_g"].reshape(1, H).astype(jnp.float32)
    bln2 = params["ln2_b"].reshape(1, H).astype(jnp.float32)

    # ---- mask specialisation (no dense [B,1,S,S] zeros are ever materialised)
    if attention_mask is None:
        mask_mode, mask_ops, mask_specs, mask_bytes = "none", (), [], 0
    elif attention_mask.shape == (B, 1, 1, S):
        mask_mode = "key"
        mask_ops = (attention_mask.reshape(B, 1, S).astype(jnp.float32),)
        mask_specs = [pl.BlockSpec((1, 1, S), lambda b: (b, 0, 0))]
        mask_bytes = 2 * _bytes((1, S), jnp.float32)
    elif attention_mask.shape == (B, 1, S, S):
        mask_mode = "full"
        mask_ops = (attention_mask.reshape(B, S, S).astype(jnp.float32),)
        mask_specs = [pl.BlockSpec((1, S, S), lambda b: (b, 0, 0))]
        mask_bytes = 2 * _bytes((S, S), jnp.float32)
    else:
        raise ValueError(f"attention_mask must be [B,1,1,S] or [B,1,S,S]; got {attention_mask.shape}")

    # ------------------------------------------------------------- 1) fused q/k/v projection
    qkv_vmem = (2 * _bytes((row_tile, H), in_dtype)
                + _bytes((H, 3 * H), cd) + _bytes((1, 3 * H), jnp.float32)
                + 3 * 2 * _bytes((row_tile, H), cd)
                + 2 * _bytes((row_tile, 3 * H), jnp.float32))
    q2d, k2d, v2d = pl.pallas_call(
        partial(_qkv_kernel, scale=scale, compute_dtype=cd),
        out_shape=[jax.ShapeDtypeStruct((Mp, H), cd) for _ in range(3)],
        grid_spec=pltpu.PrefetchScalarGridSpec(
            num_scalar_prefetch=0,
            grid=(n_row,),
            in_specs=[
                pl.BlockSpec((row_tile, H), lambda i: (i, 0)),   # x tile (double-buffered)
                _const_spec((H, 3 * H)),                         # W_qkv (resident, 1 buffer)
                _const_spec((1, 3 * H)),                         # b_qkv
            ],
            out_specs=[pl.BlockSpec((row_tile, H), lambda i: (i, 0)) for _ in range(3)],
        ),
        compiler_params=pltpu.CompilerParams(
            dimension_semantics=("parallel",),
            vmem_limit_bytes=_vmem_limit(qkv_vmem, vmem_cap)),
        cost_estimate=pl.CostEstimate(
            flops=2 * Mp * H * 3 * H,
            transcendentals=0,
            bytes_accessed=Mp * H * jnp.dtype(in_dtype).itemsize
            + 3 * H * H * cb + 3 * Mp * H * cb),
    )(x2d_p, w_qkv, b_qkv)

    # ------------------------------------------------------------- 2) attention, one batch per step
    def _unpad(t):
        return t[:M] if Mp != M else t

    q3 = _unpad(q2d).reshape(B, S, H)        # free reshapes when no padding (divisor tiles)
    k3 = _unpad(k2d).reshape(B, S, H)
    v3 = _unpad(v2d).reshape(B, S, H)

    attn_kernel = _make_attn_kernel(num_heads=num_heads, mask_mode=mask_mode,
                                    compute_dtype=cd,
                                    approx_recip=(cd != jnp.float32))
    attn_vmem = (3 * 2 * _bytes((S, H), cd)              # q/k/v blocks (double-buffered)
                 + 2 * _bytes((S, H), cd)                # context output block
                 + mask_bytes
                 + 2 * _bytes((S, S), jnp.float32)       # score / prob temporaries
                 + 2 * _bytes((S, Dh), jnp.float32))
    # TODO(synk): flash-style K/V tiling (online softmax) for S >~ 2000 on v7x's 64 MiB VMEM.
    ctx3 = pl.pallas_call(
        attn_kernel,
        out_shape=jax.ShapeDtypeStruct((B, S, H), cd),
        grid_spec=pltpu.PrefetchScalarGridSpec(
            num_scalar_prefetch=0,
            grid=(B,),
            in_specs=[pl.BlockSpec((1, S, H), lambda b: (b, 0, 0)) for _ in range(3)]
                     + mask_specs,
            out_specs=pl.BlockSpec((1, S, H), lambda b: (b, 0, 0)),
        ),
        compiler_params=pltpu.CompilerParams(
            dimension_semantics=("parallel",),
            vmem_limit_bytes=_vmem_limit(attn_vmem, vmem_cap)),
        cost_estimate=pl.CostEstimate(
            flops=4 * B * num_heads * S * S * Dh,
            transcendentals=B * num_heads * S * S,
            bytes_accessed=4 * B * S * H * cb
            + (B * S * S * 4 if mask_mode == "full" else B * S * 4)),
    )(q3, k3, v3, *mask_ops)

    ctx2d = ctx3.reshape(M, H)
    ctx2d_p = jnp.pad(ctx2d, ((0, Mp - M), (0, 0))) if Mp != M else ctx2d

    # ------------------------------------------------------------- 3) out-proj + LN1 + FFN + LN2 (fused)
    fused_vmem = (2 * _bytes((row_tile, H), cd)                    # ctx tiles
                  + 2 * _bytes((row_tile, H), in_dtype)            # residual tiles
                  + 2 * _bytes((row_tile, H), in_dtype)            # output tiles
                  + _bytes((H, H), cd) + _bytes((H, I), cd) + _bytes((I, H), cd)  # 1-buffer weights
                  + 6 * _bytes((1, H), jnp.float32) + _bytes((1, I), jnp.float32)
                  + 2 * _bytes((row_tile, I), jnp.float32)         # GELU intermediate temporaries
                  + 4 * _bytes((row_tile, H), jnp.float32))        # f32 LN/residual temporaries
    out2d_p = pl.pallas_call(
        partial(_attn_out_ffn_kernel, eps=layer_norm_eps, compute_dtype=cd),
        out_shape=jax.ShapeDtypeStruct((Mp, H), in_dtype),
        grid_spec=pltpu.PrefetchScalarGridSpec(
            num_scalar_prefetch=0,
            grid=(n_row,),
            in_specs=[
                pl.BlockSpec((row_tile, H), lambda i: (i, 0)),     # attention context tile
                pl.BlockSpec((row_tile, H), lambda i: (i, 0)),     # residual (original x) tile
                _const_spec((H, H)),                               # W_o (resident, 1 buffer)
                _const_spec((1, H)),                               # b_o
                _const_spec((1, H)),                               # ln1 gamma
                _const_spec((1, H)),                               # ln1 beta
                _const_spec((H, I)),                               # W1 (resident, 1 buffer)
                _const_spec((1, I)),                               # b1
                _const_spec((I, H)),                               # W2 (resident, 1 buffer)
                _const_spec((1, H)),                               # b2
                _const_spec((1, H)),                               # ln2 gamma
                _const_spec((1, H)),                               # ln2 beta
            ],
            out_specs=pl.BlockSpec((row_tile, H), lambda i: (i, 0)),
        ),
        compiler_params=pltpu.CompilerParams(
            dimension_semantics=("parallel",),
            vmem_limit_bytes=_vmem_limit(fused_vmem, vmem_cap)),
        cost_estimate=pl.CostEstimate(
            flops=2 * Mp * H * H + 4 * Mp * H * I + 20 * Mp * H,
            transcendentals=Mp * I + 2 * Mp,
            bytes_accessed=2 * Mp * H * cb + 2 * Mp * H * jnp.dtype(in_dtype).itemsize
            + (H * H + 2 * H * I) * cb),
    )(ctx2d_p, x2d_p, w_o, b_o, g1, bln1, w1, b1, w2, b2, g2, bln2)

    out2d = out2d_p[:M] if Mp != M else out2d_p
    return out2d.reshape(B, S, H)


# ----------------------------------------------------------------------------- reference
def _layer_norm(x, g, b, eps):
    mu = jnp.mean(x, axis=-1, keepdims=True)
    d = x - mu
    var = jnp.mean(d * d, axis=-1, keepdims=True)
    return d * lax.rsqrt(var + eps) * g + b


def _reference(x, p, mask, num_heads, eps):
    B, S, H = x.shape
    Dh = H // num_heads
    scale = Dh ** -0.5
    q = (x @ p["q_w"] + p["q_b"]) * scale
    k = x @ p["k_w"] + p["k_b"]
    v = x @ p["v_w"] + p["v_b"]

    def split(t):
        return t.reshape(B, S, num_heads, Dh).transpose(0, 2, 1, 3)

    q, k, v = split(q), split(k), split(v)
    s = jnp.einsum("bhqd,bhkd->bhqk", q, k)
    if mask is not None:
        s = s + mask
    pw = jax.nn.softmax(s, axis=-1)
    ctx = jnp.einsum("bhqk,bhkd->bhqd", pw, v)
    ctx = ctx.transpose(0, 2, 1, 3).reshape(B, S, H)
    attn_out = ctx @ p["o_w"] + p["o_b"]
    h = _layer_norm(x + attn_out, p["ln1_g"], p["ln1_b"], eps)
    ff = h @ p["w1"] + p["b1"]
    ff = 0.5 * ff * (1.0 + lax.erf(ff * _INV_SQRT2))
    ff = ff @ p["w2"] + p["b2"]
    return _layer_norm(h + ff, p["ln2_g"], p["ln2_b"], eps)


# ----------------------------------------------------------------------------- test
if __name__ == "__main__":
    # Small config consistent with the module: hidden=32, heads=4, intermediate=128.
    # NOTE: perf conclusions must be drawn at real Wav2Vec2 shapes (H=768/1024, I=3072/4096).
    B, S, H, NH, I = 2, 8, 32, 4, 128
    eps = 1e-5

    key = jax.random.PRNGKey(0)
    ks = jax.random.split(key, 18)

    def normal(k, shape, s):
        return jax.random.normal(k, shape, dtype=jnp.float32) * s

    x = normal(ks[0], (B, S, H), 1.0)
    params = {
        "q_w": normal(ks[1], (H, H), 1 / math.sqrt(H)), "q_b": normal(ks[2], (H,), 0.02),
        "k_w": normal(ks[3], (H, H), 1 / math.sqrt(H)), "k_b": normal(ks[4], (H,), 0.02),
        "v_w": normal(ks[5], (H, H), 1 / math.sqrt(H)), "v_b": normal(ks[6], (H,), 0.02),
        "o_w": normal(ks[7], (H, H), 1 / math.sqrt(H)), "o_b": normal(ks[8], (H,), 0.02),
        "ln1_g": 1.0 + normal(ks[9], (H,), 0.05), "ln1_b": normal(ks[10], (H,), 0.05),
        "w1": normal(ks[11], (H, I), 1 / math.sqrt(H)), "b1": normal(ks[12], (I,), 0.02),
        "w2": normal(ks[13], (I, H), 1 / math.sqrt(I)), "b2": normal(ks[14], (H,), 0.02),
        "ln2_g": 1.0 + normal(ks[15], (H,), 0.05), "ln2_b": normal(ks[16], (H,), 0.05),
    }
    # Additive masks: batch 1 cannot attend to its last two frames.
    mask_full = jnp.zeros((B, 1, S, S), jnp.float32).at[1, :, :, S - 2:].set(-1e9)
    mask_key = jnp.zeros((B, 1, 1, S), jnp.float32).at[1, :, :, S - 2:].set(-1e9)

    ref_mask = _reference(x, params, mask_full, NH, eps)
    ref_none = _reference(x, params, None, NH, eps)

    # f32 compute path, full [B,1,S,S] mask.
    out_f32 = wav2vec2_encoder_layer(
        x, params, attention_mask=mask_full, num_heads=NH, layer_norm_eps=eps,
        compute_dtype=jnp.float32)
    out_f32 = jax.block_until_ready(out_f32)
    assert out_f32.shape == (B, S, H)
    assert jnp.allclose(out_f32, ref_mask, atol=2e-2, rtol=2e-2), "f32 full-mask mismatch"

    # f32 compute path, compact [B,1,1,S] key mask (same masking as full mask above).
    out_key = wav2vec2_encoder_layer(
        x, params, attention_mask=mask_key, num_heads=NH, layer_norm_eps=eps,
        compute_dtype=jnp.float32)
    out_key = jax.block_until_ready(out_key)
    assert jnp.allclose(out_key, ref_mask, atol=2e-2, rtol=2e-2), "f32 key-mask mismatch"

    # f32 compute path, no mask (mask operand is skipped entirely).
    out_none = wav2vec2_encoder_layer(
        x, params, attention_mask=None, num_heads=NH, layer_norm_eps=eps,
        compute_dtype=jnp.float32)
    out_none = jax.block_until_ready(out_none)
    assert jnp.allclose(out_none, ref_none, atol=2e-2, rtol=2e-2), "f32 no-mask mismatch"

    # Mixed-precision path (bf16 MXU operands, f32 accumulation) — loose tolerance.
    out_bf16 = wav2vec2_encoder_layer(
        x, params, attention_mask=mask_full, num_heads=NH, layer_norm_eps=eps,
        compute_dtype=jnp.bfloat16)
    out_bf16 = jax.block_until_ready(out_bf16)
    assert jnp.allclose(out_bf16.astype(jnp.float32), ref_mask, atol=0.2, rtol=0.1), \
        "bf16 mismatch vs reference"

    print("KERNEL_OK")
</pallas_src>

<mosaic_0001>
module attributes {stable_mosaic.version = 11 : i64} {
  func.func @_qkv_kernel(%arg0: i32, %arg1: memref<16x32xf32, #tpu.memory_space<vmem>>, %arg2: memref<32x96xf32, #tpu.memory_space<vmem>>, %arg3: memref<1x96xf32, #tpu.memory_space<vmem>>, %arg4: memref<16x32xf32, #tpu.memory_space<vmem>>, %arg5: memref<16x32xf32, #tpu.memory_space<vmem>>, %arg6: memref<16x32xf32, #tpu.memory_space<vmem>>) attributes {dimension_semantics = [#tpu.dimension_semantics<parallel>], iteration_bounds = array<i64: 1>, scalar_prefetch = 0 : i64, scratch_operands = 0 : i64, tpu.core_type = #tpu.core_type<tc>, window_params = [{transform_indices = @transform_0, window_bounds = array<i64: 16, 32>}, {pipeline_mode = #tpu.pipeline_mode<synchronous>, transform_indices = @transform_1, window_bounds = array<i64: 32, 96>}, {pipeline_mode = #tpu.pipeline_mode<synchronous>, transform_indices = @transform_2, window_bounds = array<i64: 1, 96>}, {transform_indices = @transform_3, window_bounds = array<i64: 16, 32>}, {transform_indices = @transform_4, window_bounds = array<i64: 16, 32>}, {transform_indices = @transform_5, window_bounds = array<i64: 16, 32>}]} {
    %c0 = arith.constant 0 : index
    %c0_0 = arith.constant 0 : index
    %0 = vector.load %arg1[%c0, %c0_0] : memref<16x32xf32, #tpu.memory_space<vmem>>, vector<16x32xf32>
    %c0_1 = arith.constant 0 : index
    %c0_2 = arith.constant 0 : index
    %1 = vector.load %arg2[%c0_1, %c0_2] : memref<32x96xf32, #tpu.memory_space<vmem>>, vector<32x96xf32>
    %cst = arith.constant dense<0.000000e+00> : vector<16x96xf32>
    %2 = tpu.matmul %0, %1, %cst {dimension_numbers = #tpu.dot_dimension_numbers<[1], [0], [0], [1], [0, 0, 1, 1], [], []>} : vector<16x32xf32>, vector<32x96xf32>, vector<16x96xf32> -> vector<16x96xf32>
    %c0_3 = arith.constant 0 : index
    %c0_4 = arith.constant 0 : index
    %3 = vector.load %arg3[%c0_3, %c0_4] : memref<1x96xf32, #tpu.memory_space<vmem>>, vector<1x96xf32>
    %4 = vector.broadcast %3 : vector<1x96xf32> to vector<16x96xf32>
    %5 = arith.addf %2, %4 : vector<16x96xf32>
    %6 = vector.extract_strided_slice %5 {offsets = [0, 0], sizes = [16, 32], strides = [1, 1]} : vector<16x96xf32> to vector<16x32xf32>
    %cst_5 = arith.constant 0.353553385 : f32
    %7 = vector.broadcast %cst_5 : f32 to vector<16x32xf32>
    %8 = arith.mulf %6, %7 : vector<16x32xf32>
    %c0_6 = arith.constant 0 : index
    %c0_7 = arith.constant 0 : index
    %9 = vector.load %arg4[%c0_6, %c0_7] : memref<16x32xf32, #tpu.memory_space<vmem>>, vector<16x32xf32>
    tpu.vector_store %arg4[%c0_6, %c0_7], %8 {strides = array<i32>} : memref<16x32xf32, #tpu.memory_space<vmem>>, vector<16x32xf32>,
    %10 = vector.extract_strided_slice %5 {offsets = [0, 32], sizes = [16, 32], strides = [1, 1]} : vector<16x96xf32> to vector<16x32xf32>
    %c0_8 = arith.constant 0 : index
    %c0_9 = arith.constant 0 : index
    %11 = vector.load %arg5[%c0_8, %c0_9] : memref<16x32xf32, #tpu.memory_space<vmem>>, vector<16x32xf32>
    tpu.vector_store %arg5[%c0_8, %c0_9], %10 {strides = array<i32>} : memref<16x32xf32, #tpu.memory_space<vmem>>, vector<16x32xf32>,
    %12 = vector.extract_strided_slice %5 {offsets = [0, 64], sizes = [16, 32], strides = [1, 1]} : vector<16x96xf32> to vector<16x32xf32>
    %c0_10 = arith.constant 0 : index
    %c0_11 = arith.constant 0 : index
    %13 = vector.load %arg6[%c0_10, %c0_11] : memref<16x32xf32, #tpu.memory_space<vmem>>, vector<16x32xf32>
    tpu.vector_store %arg6[%c0_10, %c0_11], %12 {strides = array<i32>} : memref<16x32xf32, #tpu.memory_space<vmem>>, vector<16x32xf32>,
    return
  }
  func.func @transform_0(%arg0: i32) -> (i32, i32) {
    %c0_i32 = arith.constant 0 : i32
    %c0_i32_0 = arith.constant 0 : i32
    return %arg0, %c0_i32 : i32, i32
  }
  func.func @transform_1(%arg0: i32) -> (i32, i32) {
    %c0_i32 = arith.constant 0 : i32
    %c0_i32_0 = arith.constant 0 : i32
    %c0_i32_1 = arith.constant 0 : i32
    return %c0_i32, %c0_i32_0 : i32, i32
  }
  func.func @transform_2(%arg0: i32) -> (i32, i32) {
    %c0_i32 = arith.constant 0 : i32
    %c0_i32_0 = arith.constant 0 : i32
    %c0_i32_1 = arith.constant 0 : i32
    return %c0_i32, %c0_i32_0 : i32, i32
  }
  func.func @transform_3(%arg0: i32) -> (i32, i32) {
    %c0_i32 = arith.constant 0 : i32
    %c0_i32_0 = arith.constant 0 : i32
    return %arg0, %c0_i32 : i32, i32
  }
  func.func @transform_4(%arg0: i32) -> (i32, i32) {
    %c0_i32 = arith.constant 0 : i32
    %c0_i32_0 = arith.constant 0 : i32
    return %arg0, %c0_i32 : i32, i32
  }
  func.func @transform_5(%arg0: i32) -> (i32, i32) {
    %c0_i32 = arith.constant 0 : i32
    %c0_i32_0 = arith.constant 0 : i32
    return %arg0, %c0_i32 : i32, i32
  }
}

</mosaic_0001>

<bundles_post_ra>
// kernel: tpu_custom_call.1
= control target key start
LH: loop header
LB: loop body
LE: loop exit
PB: predicated region body
PF: predicated region fallthrough
CT: control target
= control target key end

     0   :  { %11 = vsyncpa [#allocation3], 0  ;;  %s392_s0 = inlined_call_operand.hbm [shape: f32[16,32], index: 0, kind: input, shape index: {}]   ;;  %s393_s1 = inlined_call_operand.hbm [shape: f32[32,96], index: 1, kind: input, shape index: {}]   ;;  %s394_s2 = inlined_call_operand.vmem [shape: f32[1,96], index: 2, kind: input, shape index: {}]   ;;  %s395_s3 = inlined_call_operand.hbm [shape: f32[16,32], index: 3, kind: output, shape index: {0}]   ;;  %s396_s4 = inlined_call_operand.hbm [shape: f32[16,32], index: 4, kind: output, shape index: {1}]   ;;  %s397_s5 = inlined_call_operand.hbm [shape: f32[16,32], index: 5, kind: output, shape index: {2}]  }
   0x1   :  { %12 = vsyncpa [#allocation6], 0 }
   0x2   :  { %13 = vsyncpa [#allocation4], 0 }
   0x3   :  { %14 = vsyncpa [#allocation9], 0  ;;  %s19_s20 = sshll.u32 %s392_s0, 4  ;;  %s312_s21 = smov [#allocation2]   ;;  %s20_s20 = int_to_ptr.hbm [resolvable:$true] %s19_s20 }
   0x4   :  { %s21_s22 = sshll.u32 %s312_s21, 4  ;;  %s32_s25 = sshll.u32 %s393_s1, 4  ;;  %s22_s22 = int_to_ptr.vmem [resolvable:$true] %s21_s22  ;;  %s33_s25 = int_to_ptr.hbm [resolvable:$true] %s32_s25 }
   0x5   :  { %s313_s26 = smov 128   ;;  %s314_s27 = smov 8  }
   0x6   :  { %27 = dma.hbm_to_vmem [thread:$0]  %s20_s20, 256, %s22_s22, [#allocation3], %s313_s26, %s313_s26, %s314_s27  }
   0x7   :  { %s315_s28 = smov [#allocation5]  }
   0x8   :  { %s34_s29 = sshll.u32 %s315_s28, 4  ;;  %s35_s29 = int_to_ptr.vmem [resolvable:$true] %s34_s29 }
   0x9   :  { %40 = dma.hbm_to_vmem [thread:$0]  %s33_s25, 512, %s35_s29, [#allocation6], %s313_s26, %s313_s26, %s314_s27  }
   0xa   :  { %304 = dma.done.wait [#allocation3], 256  }
   0xb   :  { %305 = vsyncadd [#allocation3], 4294967040 }
   0xc   :  { %306 = dma.done.wait [#allocation6], 512  }
   0xd   :  { %307 = vsyncadd [#allocation6], 4294966784  ;;  %v56_v0 = vld [vmem:[#allocation5 + $0x18] sm:$0xff]  ;;  %v55_v1 = vld [vmem:[#allocation5 + $0x10] sm:$0xff]  ;;  %vm61_vm0 = vcmask 261120   ;;  %s316_s30 = smov [#allocation7]  }
   0xe   :  { %80 = vmatpush.msra.mxu0 %v56_v0  ;;  %170 = vmatpush.msra.mxu1 %v56_v0  ;;  %v54_v2 = vld [vmem:[#allocation5 + $0x8] sm:$0xff]  ;;  %v53_v3 = vld [vmem:[#allocation5] sm:$0xff]  ;;  %v51_v4 = vld [vmem:[#allocation2] sm:$0xff]  ;;  %s117_s6 = sshll.u32 %s316_s30, 4  ;;  %s119_s9 = sshll.u32 %s395_s3, 4  ;;  %s118_s6 = int_to_ptr.vmem [resolvable:$true] %s117_s6  ;;  %s120_s9 = int_to_ptr.hbm [resolvable:$true] %s119_s9 }
   0xf   :  { %v52_v5 = vld [vmem:[#allocation2 + $0x8] sm:$0xff]  ;;  %v183_v6 = vld [vmem:[%s394_s2] ss:$0 sm:$0xff]  ;;  %s317_s10 = smov 64   ;;  %s318_s11 = smov 96  }
  0x10   :  { %81 = vmatpush.msra.mxu0 %v55_v1  ;;  %171 = vmatpush.msra.mxu1 %v55_v1  ;;  %s319_s2 = smov [#allocation8]   ;;  %s132_s14 = sshll.u32 %s396_s4, 4  ;;  %s133_s14 = int_to_ptr.hbm [resolvable:$true] %s132_s14 }
  0x11   :  { %s130_s3 = sshll.u32 %s319_s2, 4  ;;  %s320_s15 = smov [#allocation10]   ;;  %s131_s3 = int_to_ptr.vmem [resolvable:$true] %s130_s3 }
  0x12   :  { %82 = vmatpush.msra.mxu0 %v54_v2  ;;  %172 = vmatpush.msra.mxu1 %v54_v2  ;;  %s143_s16 = sshll.u32 %s320_s15, 4  ;;  %s145_s19 = sshll.u32 %s397_s5, 4  ;;  %s144_s16 = int_to_ptr.vmem [resolvable:$true] %s143_s16  ;;  %s146_s19 = int_to_ptr.hbm [resolvable:$true] %s145_s19 }
  0x14   :  { %83 = vmatpush.msra.mxu0 %v53_v3  ;;  %173 = vmatpush.msra.mxu1 %v53_v3 }
  0x15   :  { %168 = vmatmul.msk.f32.vlgmr.msra.gmra.mxu0 %vm61_vm0, %v51_v4  ;;  %169 = vmatmul.msk.f32.vlgmr.msra.gmra.mxu1 %vm61_vm0, %v52_v5 }
  0x92   :  { %v85_v7 = vpop.f32.mrf.mxu0  ;;  %v88_v8 = vpop.f32.mrf.mxu1 }
  0x93   :  { %v86_v9 = vadd.f32 %v183_v6, %v85_v7  ;;  %v89_v10 = vadd.f32 %v183_v6, %v88_v8 }
  0x95   :  { %v91_v11 = vmul.f32 0.35355338, %v86_v9  ;;  %105 = vrot.lane.b32.xlu1 %v86_v9, %s317_s10  ;;  %97 = vrot.lane.b32.xlu0 %v86_v9, %s318_s11  ;;  %v92_v12 = vmul.f32 0.35355338, %v89_v10 }
  0x97   :  { %93 = vst.msk [vmem:[#allocation7] sm:$0xff] %vm61_vm0, %v91_v11 }
  0x98   :  { %94 = vst.msk [vmem:[#allocation7 + $0x8] sm:$0xff] %vm61_vm0, %v92_v12 }
  0x99   :  { %125 = dma.vmem_to_hbm [thread:$0]  %s118_s6, 256, %s120_s9, [#allocation4], %s313_s26, %s313_s26, %s314_s27  }
  0x9d   :  { %107 = vrot.lane.b32.xlu1 %v89_v10, %s317_s10  ;;  %99 = vrot.lane.b32.xlu0 %v89_v10, %s318_s11 }
 0x107   :  { %v106_v13 = vpop.permute.xlu1 %105  ;;  %v98_v14 = vpop.permute.xlu0 %97 }
 0x108   :  { %111 = vst.msk [vmem:[#allocation10] sm:$0xff] %vm61_vm0, %v106_v13 }
 0x109   :  { %103 = vst.msk [vmem:[#allocation8] sm:$0xff] %vm61_vm0, %v98_v14 }
 0x10f   :  { %v108_v15 = vpop.permute.xlu1 %107  ;;  %v100_v16 = vpop.permute.xlu0 %99 }
 0x110   :  { %112 = vst.msk [vmem:[#allocation10 + $0x8] sm:$0xff] %vm61_vm0, %v108_v15 }
 0x111   :  { %104 = vst.msk [vmem:[#allocation8 + $0x8] sm:$0xff] %vm61_vm0, %v100_v16 }
 0x112   :  { %138 = dma.vmem_to_hbm [thread:$0]  %s131_s3, 256, %s133_s14, [#allocation9], %s313_s26, %s313_s26, %s314_s27  }
 0x113   :  { %151 = dma.vmem_to_hbm [thread:$0]  %s144_s16, 256, %s146_s19, [#allocation9], %s313_s26, %s313_s26, %s314_s27  }
 0x114   :  { %308 = dma.done.wait [#allocation4], 256  }
 0x115   :  { %309 = vsyncadd [#allocation4], 4294967040 }
 0x116   :  { %310 = dma.done.wait [#allocation9], 512  }
 0x117   :  { %311 = vsyncadd [#allocation9], 4294966784 }
 0x118   :  { %164 = vsyncpa [#allocation3], 1 }
 0x119   :  { %165 = vsyncpa [#allocation6], 1 }
 0x11a   :  { %166 = vsyncpa [#allocation4], 1 }
 0x11b   :  { %167 = vsyncpa [#allocation9], 1 }

</bundles_post_ra>
